<compile_context>
chip_gen: v7x
topology: tpu7x:2x2x1
jax: 0.10.0
libtpu: 0.0.40
codegen_flags: <defaults>
</compile_context>

<pallas_src>
import jax
import jax.numpy as jnp
from jax import lax
from jax.experimental import pallas as pl
from jax.experimental.pallas import tpu as pltpu

NEG_SLOPE = 0.01   # nn.LeakyReLU() default
BN_EPS = 1e-5

_LANE = 128
_SUBLANE = 8
_VMEM_BUDGET = 40 * 1024 * 1024   # keep estimated usage under this (safe on v5e/v6e/v7x)
_VMEM_LIMIT = 48 * 1024 * 1024    # scoped-VMEM limit passed to Mosaic when needed


def _round_up(x, m):
    return (x + m - 1) // m * m


def _encblock_kernel(x_ref, w_ref, bss_ref, o_ref):
    # x_ref : (TM, Kp)   bf16 im2col patch rows
    # w_ref : (Kp, OCp)  bf16 conv weight as matmul rhs (zero-padded)
    # bss_ref: (8, OCp)  f32 -- row 0: conv bias, row 1: BN scale, row 2: BN shift
    # o_ref : (TM, OCp)  f32
    acc = jnp.dot(x_ref[...], w_ref[...], preferred_element_type=jnp.float32)
    bss = bss_ref[...]
    acc = acc + bss[0:1, :]                              # conv bias
    acc = jnp.where(acc >= 0, acc, NEG_SLOPE * acc)      # LeakyReLU
    # Dropout2d(0.5): identity in eval mode.
    o_ref[...] = acc * bss[1:2, :] + bss[2:3, :]         # BatchNorm2d (eval, folded)


def _im2col(x_nchw, kernel, stride, pad):
    """x_nchw: (N, C, H, W) -> (N*Ho*Wo, C*KH*KW), column order = (ic, kh, kw)."""
    N, C, H, W = x_nchw.shape
    Ho = (H + 2 * pad - kernel) // stride + 1
    Wo = (W + 2 * pad - kernel) // stride + 1
    xp = jnp.pad(x_nchw, ((0, 0), (0, 0), (pad, pad), (pad, pad)))
    rows = []
    for kh in range(kernel):
        cols = []
        for kw in range(kernel):
            cols.append(
                xp[:, :, kh:kh + stride * Ho:stride, kw:kw + stride * Wo:stride]
            )  # (N, C, Ho, Wo)
        rows.append(jnp.stack(cols, axis=-1))       # (N, C, Ho, Wo, KW)
    patches = jnp.stack(rows, axis=-2)              # (N, C, Ho, Wo, KH, KW)
    patches = patches.transpose(0, 2, 3, 1, 4, 5)   # (N, Ho, Wo, C, KH, KW)
    return patches.reshape(N * Ho * Wo, C * kernel * kernel), Ho, Wo


def enc_block_forward(x_nchw, params, *, kernel=4, stride=4, pad=1):
    """EncBlock forward. x_nchw: (N, in_ch, H, W) float32 -> (N, out_ch, Ho, Wo) float32."""
    w = params["conv_w"]           # (out_ch, in_ch, KH, KW)
    b = params["conv_b"]           # (out_ch,)
    gamma = params["bn_gamma"]     # (out_ch,)
    beta = params["bn_beta"]
    rmean = params["bn_mean"]
    rvar = params["bn_var"]

    N, C, H, W = x_nchw.shape
    OC = w.shape[0]

    # TODO(synk): the im2col patches are still materialized in HBM by the wrapper;
    # an in-kernel gather over an NHWC input would remove that extra HBM pass.
    X, Ho, Wo = _im2col(x_nchw, kernel, stride, pad)          # (M, K) f32
    M, K = X.shape
    W_mat = w.reshape(OC, C * kernel * kernel).T              # (K, OC)

    # Fold BN (eval) into per-channel scale/shift.
    scale = gamma * lax.rsqrt(rvar + BN_EPS)                  # (OC,)
    shift = beta - rmean * scale                              # (OC,)

    # Pad K / OC to lane multiples: full-width MXU passes, unmasked output stores.
    Kp = _round_up(K, _LANE)
    OCp = _round_up(OC, _LANE)

    # Row tile: biggest that fits the VMEM budget (double-buffered ins + f32 out),
    # then pad M up to a multiple of TM (padded zero rows are sliced off below).
    def vmem_bytes(tm):
        return (2 * tm * Kp * 2          # X tile, bf16, double-buffered
                + 2 * Kp * OCp * 2       # W, bf16, double-buffered
                + 2 * _SUBLANE * OCp * 4  # packed bias/scale/shift
                + 2 * tm * OCp * 4)      # output tile, f32

    TM = 512
    while TM > _SUBLANE and vmem_bytes(TM) > _VMEM_BUDGET:
        TM //= 2
    TM = min(TM, _round_up(M, _SUBLANE))
    Mp = _round_up(M, TM)
    # TODO(synk): for very deep layers (K = in_ch*16 >= 8192) add a K grid axis
    # ("arbitrary") with an f32 VMEM accumulator instead of shrinking TM.

    Xp = jnp.zeros((Mp, Kp), jnp.bfloat16).at[:M, :K].set(X.astype(jnp.bfloat16))
    Wp = jnp.zeros((Kp, OCp), jnp.bfloat16).at[:K, :OC].set(W_mat.astype(jnp.bfloat16))
    bss = jnp.zeros((_SUBLANE, OCp), jnp.float32)
    bss = bss.at[0, :OC].set(b.astype(jnp.float32))
    bss = bss.at[1, :OC].set(scale.astype(jnp.float32))
    bss = bss.at[2, :OC].set(shift.astype(jnp.float32))

    vmem_limit = _VMEM_LIMIT if vmem_bytes(TM) > 14 * 1024 * 1024 else None

    out_mat = pl.pallas_call(
        _encblock_kernel,
        out_shape=jax.ShapeDtypeStruct((Mp, OCp), jnp.float32),
        grid_spec=pltpu.PrefetchScalarGridSpec(
            num_scalar_prefetch=0,
            grid=(Mp // TM,),
            in_specs=[
                pl.BlockSpec((TM, Kp), lambda i: (i, 0)),
                pl.BlockSpec((Kp, OCp), lambda i: (0, 0)),
                pl.BlockSpec((_SUBLANE, OCp), lambda i: (0, 0)),
            ],
            out_specs=pl.BlockSpec((TM, OCp), lambda i: (i, 0)),
        ),
        compiler_params=pltpu.CompilerParams(
            dimension_semantics=("parallel",),
            vmem_limit_bytes=vmem_limit),
    )(Xp, Wp, bss)

    out = out_mat[:M, :OC].reshape(N, Ho, Wo, OC)
    # TODO(synk): the NHWC->NCHW transpose is an extra HBM pass kept only to match
    # the PyTorch module's NCHW output layout; fuse into the consumer when possible.
    return out.transpose(0, 3, 1, 2)


def _reference(x_nchw, params, *, kernel=4, stride=4, pad=1):
    """Pure-JAX reference (lax conv) for validation."""
    w = params["conv_w"]
    y = lax.conv_general_dilated(
        x_nchw, w, window_strides=(stride, stride),
        padding=[(pad, pad), (pad, pad)],
        dimension_numbers=("NCHW", "OIHW", "NCHW"))
    y = y + params["conv_b"].reshape(1, -1, 1, 1)
    y = jnp.where(y >= 0, y, NEG_SLOPE * y)
    scale = params["bn_gamma"] * lax.rsqrt(params["bn_var"] + BN_EPS)
    shift = params["bn_beta"] - params["bn_mean"] * scale
    return y * scale.reshape(1, -1, 1, 1) + shift.reshape(1, -1, 1, 1)


def init_params(key, in_ch, out_ch, kernel=4):
    ks = jax.random.split(key, 6)
    return {
        "conv_w": 0.1 * jax.random.normal(ks[0], (out_ch, in_ch, kernel, kernel), jnp.float32),
        "conv_b": 0.1 * jax.random.normal(ks[1], (out_ch,), jnp.float32),
        "bn_gamma": 1.0 + 0.1 * jax.random.normal(ks[2], (out_ch,), jnp.float32),
        "bn_beta": 0.1 * jax.random.normal(ks[3], (out_ch,), jnp.float32),
        "bn_mean": 0.1 * jax.random.normal(ks[4], (out_ch,), jnp.float32),
        "bn_var": jnp.abs(1.0 + 0.1 * jax.random.normal(ks[5], (out_ch,), jnp.float32)),
    }


if __name__ == "__main__":
    key = jax.random.PRNGKey(0)
    k_x, k_p = jax.random.split(key)

    N, in_ch, H, W = 2, 4, 16, 16
    out_ch = 8

    x = jax.random.normal(k_x, (N, in_ch, H, W), jnp.float32)
    params = init_params(k_p, in_ch, out_ch)

    out = jax.block_until_ready(enc_block_forward(x, params))
    assert out.shape == (N, out_ch, 4, 4), out.shape

    # Tight check: reference fed the same bf16-rounded inputs (isolates kernel math;
    # both sides accumulate in f32, so only accumulation-order noise remains).
    x_q = x.astype(jnp.bfloat16).astype(jnp.float32)
    w_q = params["conv_w"].astype(jnp.bfloat16).astype(jnp.float32)
    ref_q = _reference(x_q, dict(params, conv_w=w_q))
    assert jnp.allclose(out, ref_q, atol=2e-3, rtol=2e-3), "mismatch vs bf16-input reference"

    # Loose check vs full-precision reference (error bounded by bf16 input quantization).
    ref = _reference(x, params)
    assert jnp.allclose(out, ref, atol=1e-1, rtol=1e-1), "mismatch vs f32 reference"

    print("KERNEL_OK")
</pallas_src>

<mosaic_0001>
module attributes {stable_mosaic.version = 11 : i64} {
  func.func @_encblock_kernel(%arg0: i32, %arg1: memref<32x128xbf16, #tpu.memory_space<vmem>>, %arg2: memref<128x128xbf16, #tpu.memory_space<vmem>>, %arg3: memref<8x128xf32, #tpu.memory_space<vmem>>, %arg4: memref<32x128xf32, #tpu.memory_space<vmem>>) attributes {dimension_semantics = [#tpu.dimension_semantics<parallel>], iteration_bounds = array<i64: 1>, scalar_prefetch = 0 : i64, scratch_operands = 0 : i64, tpu.core_type = #tpu.core_type<tc>, window_params = [{transform_indices = @transform_0, window_bounds = array<i64: 32, 128>}, {pipeline_mode = #tpu.pipeline_mode<synchronous>, transform_indices = @transform_1, window_bounds = array<i64: 128, 128>}, {pipeline_mode = #tpu.pipeline_mode<synchronous>, transform_indices = @transform_2, window_bounds = array<i64: 8, 128>}, {transform_indices = @transform_3, window_bounds = array<i64: 32, 128>}]} {
    %c0 = arith.constant 0 : index
    %c0_0 = arith.constant 0 : index
    %0 = vector.load %arg1[%c0, %c0_0] : memref<32x128xbf16, #tpu.memory_space<vmem>>, vector<32x128xbf16>
    %c0_1 = arith.constant 0 : index
    %c0_2 = arith.constant 0 : index
    %1 = vector.load %arg2[%c0_1, %c0_2] : memref<128x128xbf16, #tpu.memory_space<vmem>>, vector<128x128xbf16>
    %cst = arith.constant dense<0.000000e+00> : vector<32x128xf32>
    %2 = tpu.matmul %0, %1, %cst {dimension_numbers = #tpu.dot_dimension_numbers<[1], [0], [0], [1], [0, 0, 1, 1], [], []>} : vector<32x128xbf16>, vector<128x128xbf16>, vector<32x128xf32> -> vector<32x128xf32>
    %c0_3 = arith.constant 0 : index
    %c0_4 = arith.constant 0 : index
    %3 = vector.load %arg3[%c0_3, %c0_4] : memref<8x128xf32, #tpu.memory_space<vmem>>, vector<8x128xf32>
    %4 = vector.extract_strided_slice %3 {offsets = [0, 0], sizes = [1, 128], strides = [1, 1]} : vector<8x128xf32> to vector<1x128xf32>
    %5 = vector.broadcast %4 : vector<1x128xf32> to vector<32x128xf32>
    %6 = arith.addf %2, %5 : vector<32x128xf32>
    %cst_5 = arith.constant 0.000000e+00 : f32
    %7 = vector.broadcast %cst_5 : f32 to vector<32x128xf32>
    %8 = arith.cmpf oge, %6, %7 : vector<32x128xf32>
    %cst_6 = arith.constant 0.00999999977 : f32
    %9 = vector.broadcast %cst_6 : f32 to vector<32x128xf32>
    %10 = arith.mulf %9, %6 : vector<32x128xf32>
    %11 = arith.select %8, %6, %10 : vector<32x128xi1>, vector<32x128xf32>
    %12 = vector.extract_strided_slice %3 {offsets = [1, 0], sizes = [1, 128], strides = [1, 1]} : vector<8x128xf32> to vector<1x128xf32>
    %13 = vector.broadcast %12 : vector<1x128xf32> to vector<32x128xf32>
    %14 = arith.mulf %11, %13 : vector<32x128xf32>
    %15 = vector.extract_strided_slice %3 {offsets = [2, 0], sizes = [1, 128], strides = [1, 1]} : vector<8x128xf32> to vector<1x128xf32>
    %16 = vector.broadcast %15 : vector<1x128xf32> to vector<32x128xf32>
    %17 = arith.addf %14, %16 : vector<32x128xf32>
    %c0_7 = arith.constant 0 : index
    %c0_8 = arith.constant 0 : index
    %18 = vector.load %arg4[%c0_7, %c0_8] : memref<32x128xf32, #tpu.memory_space<vmem>>, vector<32x128xf32>
    tpu.vector_store %arg4[%c0_7, %c0_8], %17 {strides = array<i32>} : memref<32x128xf32, #tpu.memory_space<vmem>>, vector<32x128xf32>,
    return
  }
  func.func @transform_0(%arg0: i32) -> (i32, i32) {
    %c0_i32 = arith.constant 0 : i32
    %c0_i32_0 = arith.constant 0 : i32
    return %arg0, %c0_i32 : i32, i32
  }
  func.func @transform_1(%arg0: i32) -> (i32, i32) {
    %c0_i32 = arith.constant 0 : i32
    %c0_i32_0 = arith.constant 0 : i32
    %c0_i32_1 = arith.constant 0 : i32
    return %c0_i32, %c0_i32_0 : i32, i32
  }
  func.func @transform_2(%arg0: i32) -> (i32, i32) {
    %c0_i32 = arith.constant 0 : i32
    %c0_i32_0 = arith.constant 0 : i32
    %c0_i32_1 = arith.constant 0 : i32
    return %c0_i32, %c0_i32_0 : i32, i32
  }
  func.func @transform_3(%arg0: i32) -> (i32, i32) {
    %c0_i32 = arith.constant 0 : i32
    %c0_i32_0 = arith.constant 0 : i32
    return %arg0, %c0_i32 : i32, i32
  }
}

</mosaic_0001>

<bundles_post_ra>
// kernel: tpu_custom_call.1
= control target key start
LH: loop header
LB: loop body
LE: loop exit
PB: predicated region body
PF: predicated region fallthrough
CT: control target
= control target key end

     0   :  { %8 = vsyncpa [#allocation3], 0  ;;  %s474_s0 = inlined_call_operand.hbm [shape: bf16[32,128], index: 0, kind: input, shape index: {}]   ;;  %s475_s1 = inlined_call_operand.hbm [shape: bf16[128,128], index: 1, kind: input, shape index: {}]   ;;  %s476_s2 = inlined_call_operand.hbm [shape: f32[8,128], index: 2, kind: input, shape index: {}]   ;;  %s477_s3 = inlined_call_operand.hbm [shape: f32[32,128], index: 3, kind: output, shape index: {}]  }
   0x1   :  { %9 = vsyncpa [#allocation6], 0 }
   0x2   :  { %10 = vsyncpa [#allocation4], 0  ;;  %s391_s12 = smov [#allocation5]   ;;  %s392_s14 = smov [#allocation2]  }
   0x3   :  { %s28_s13 = sshll.u32 %s391_s12, 4  ;;  %s16_s15 = sshll.u32 %s392_s14, 4  ;;  %s29_s13 = int_to_ptr.vmem [resolvable:$true] %s28_s13  ;;  %s419_s15 = int_to_ptr.vmem [resolvable:$true] %s16_s15 }
   0x4   :  { %s297_s18 = scalar_lea.hbm %s475_s1, 1024 }
   0x5   :  { %p298_p0 = scmp.ne.s32.totalorder %s475_s1, %s297_s18  ;;  %p301_p1 = scmp.lt.u32.totalorder %s297_s18, %s475_s1 }
   0x7   :  { %p303_p2 = pnand %p301_p1, %p298_p0 }
   0x9   :  { %306 = shalt.err (!%p303_p2)
}
   0xa   :  { %s307_s23 = scalar_lea.vmem %s29_s13, 1024  ;;  %p312_p4 = scmp.lt.s32.totalorder %s29_s13, %s29_s13 }
   0xb   :  { %p308_p3 = scmp.ne.s32.totalorder %s29_s13, %s307_s23  ;;  %p313_p5 = scmp.lt.s32.totalorder %s307_s23, %s307_s23 }
   0xd   :  { %p314_p6 = por %p313_p5, %p312_p4 }
   0xf   :  { %p315_p7 = pnand %p314_p6, %p308_p3 }
  0x11   :  { %318 = shalt.err (!%p315_p7)
}
  0x12   :  { %s393_s24 = smov 64   ;;  %s394_s25 = smov 4  }
  0x13   :  { %34 = dma.hbm_to_vmem [thread:$0]  %s475_s1, 1024, %s29_s13, [#allocation6], %s393_s24, %s393_s24, %s394_s25  }
  0x14   :  { %s319_s30 = scalar_lea.hbm %s474_s0, 256 }
  0x15   :  { %p320_p8 = scmp.ne.s32.totalorder %s474_s0, %s319_s30  ;;  %p323_p9 = scmp.lt.u32.totalorder %s319_s30, %s474_s0 }
  0x17   :  { %p325_p10 = pnand %p323_p9, %p320_p8 }
  0x19   :  { %328 = shalt.err (!%p325_p10)
}
  0x1a   :  { %s329_s8 = scalar_lea.vmem %s419_s15, 256  ;;  %p334_p12 = scmp.lt.s32.totalorder %s419_s15, %s419_s15 }
  0x1b   :  { %p330_p11 = scmp.ne.s32.totalorder %s419_s15, %s329_s8  ;;  %p335_p13 = scmp.lt.s32.totalorder %s329_s8, %s329_s8 }
  0x1d   :  { %p336_p0 = por %p335_p13, %p334_p12 }
  0x1f   :  { %p337_p1 = pnand %p336_p0, %p330_p11 }
  0x21   :  { %340 = shalt.err (!%p337_p1)
}
  0x22   :  { %22 = dma.hbm_to_vmem [thread:$0]  %s474_s0, 256, %s419_s15, [#allocation3], %s393_s24, %s393_s24, %s394_s25  }
  0x23   :  { %s395_s10 = smov [#allocation7]   ;;  %s341_s14 = scalar_lea.hbm %s476_s2, 128 }
  0x24   :  { %s41_s11 = sshll.u32 %s395_s10, 4  ;;  %p342_p2 = scmp.ne.s32.totalorder %s476_s2, %s341_s14  ;;  %s42_s11 = int_to_ptr.vmem [resolvable:$true] %s41_s11 }
  0x25   :  { %p345_p3 = scmp.lt.u32.totalorder %s341_s14, %s476_s2 }
  0x27   :  { %p347_p4 = pnand %p345_p3, %p342_p2 }
  0x29   :  { %350 = shalt.err (!%p347_p4)
}
  0x2a   :  { %s351_s20 = scalar_lea.vmem %s42_s11, 128  ;;  %p356_p6 = scmp.lt.s32.totalorder %s42_s11, %s42_s11 }
  0x2b   :  { %p352_p5 = scmp.ne.s32.totalorder %s42_s11, %s351_s20  ;;  %p357_p7 = scmp.lt.s32.totalorder %s351_s20, %s351_s20 }
  0x2d   :  { %p358_p8 = por %p357_p7, %p356_p6 }
  0x2f   :  { %p359_p9 = pnand %p358_p8, %p352_p5 }
  0x31   :  { %362 = shalt.err (!%p359_p9)
}
  0x32   :  { %44 = dma.hbm_to_vmem [thread:$0]  %s476_s2, 128, %s42_s11, [#allocation6]  }
  0x33   :  { %385 = dma.done.wait [#allocation3], 256  }
  0x34   :  { %386 = vsyncadd [#allocation3], 4294967040 }
  0x35   :  { %387 = dma.done.wait [#allocation6], 1152  }
  0x36   :  { %388 = vsyncadd [#allocation6], 4294966144  ;;  %v287_v0 = vld [vmem:[#allocation5] sm:$0xff]   ;;  %v288_v1 = vld [vmem:[#allocation5 + $0x8] sm:$0xff]   ;;  %v76_v10 = vlaneseq  ;;  %s396_s2 = smov [#allocation8]  }
  0x37   :  { %259 = vmatprep.subr.bf16.mxu0 %v287_v0  ;;  %v289_v2 = vld [vmem:[#allocation5 + $0x10] sm:$0xff]   ;;  %v290_v3 = vld [vmem:[#allocation5 + $0x18] sm:$0xff]   ;;  %v291_v5 = vld [vmem:[#allocation5 + $0x20] sm:$0xff]   ;;  %s226_s21 = sshll.u32 %s396_s2, 4  ;;  %s227_s21 = int_to_ptr.vmem [resolvable:$true] %s226_s21 }
  0x38   :  { %260 = vmatpush3.bf16.msra.mxu0 %v287_v0  ;;  %v295_v4 = vld [vmem:[#allocation2] sm:$0xff]   ;;  %v292_v6 = vld [vmem:[#allocation5 + $0x28] sm:$0xff]   ;;  %v294_v8 = vld [vmem:[#allocation5 + $0x38] sm:$0xff]   ;;  %v77_v11 = vshrl.u32 %v76_v10, 7  ;;  %s363_s22 = scalar_lea.vmem %s227_s21, 512  ;;  %p368_p11 = scmp.lt.s32.totalorder %s227_s21, %s227_s21 }
  0x39   :  { %261 = vmatprep.subr.bf16.mxu0 %v288_v1  ;;  %275 = vmatprep.mubr.bf16.mxu0 %v295_v4  ;;  %v293_v7 = vld [vmem:[#allocation5 + $0x30] sm:$0xff]   ;;  %v296_v9 = vld [vmem:[#allocation2 + $0x8] sm:$0xff]   ;;  %v75_v13 = vld [vmem:[#allocation7] sm:$0xff]  ;;  %p364_p10 = scmp.ne.s32.totalorder %s227_s21, %s363_s22  ;;  %p369_p12 = scmp.lt.s32.totalorder %s363_s22, %s363_s22 }
  0x3a   :  { %v78_v12 = vsub.s32 0, %v77_v11  ;;  %v203_v15 = vsub.s32 1, %v77_v11  ;;  %v211_v17 = vsub.s32 2, %v77_v11 }
  0x3b   :  { %p370_p13 = por %p369_p12, %p368_p11 }
  0x3c   :  { %262 = vmatpush3.bf16.msra.mxu0 %v288_v1  ;;  %v79_v14 = vrot.slane %v75_v13, %v78_v12  ;;  %v204_v20 = vrot.slane %v75_v13, %v203_v15  ;;  %v212_v26 = vrot.slane %v75_v13, %v211_v17 }
  0x3d   :  { %263 = vmatprep.subr.bf16.mxu0 %v289_v2  ;;  %p371_p0 = pnand %p370_p13, %p364_p10 }
  0x40   :  { %264 = vmatpush3.bf16.msra.mxu0 %v289_v2 }
  0x41   :  { %265 = vmatprep.subr.bf16.mxu0 %v290_v3 }
  0x44   :  { %266 = vmatpush3.bf16.msra.mxu0 %v290_v3 }
  0x45   :  { %267 = vmatprep.subr.bf16.mxu0 %v291_v5 }
  0x48   :  { %268 = vmatpush3.bf16.msra.mxu0 %v291_v5 }
  0x49   :  { %269 = vmatprep.subr.bf16.mxu0 %v292_v6 }
  0x4c   :  { %270 = vmatpush3.bf16.msra.mxu0 %v292_v6 }
  0x4d   :  { %271 = vmatprep.subr.bf16.mxu0 %v293_v7 }
  0x50   :  { %272 = vmatpush3.bf16.msra.mxu0 %v293_v7 }
  0x51   :  { %273 = vmatprep.subr.bf16.mxu0 %v294_v8 }
  0x54   :  { %274 = vmatpush3.bf16.msra.mxu0 %v294_v8 }
  0x57   :  { %276 = vmatmul.mubr.bf16.vlgmr.msra.gmra.mrb[0].mxu0 %v296_v9 }
 0x12a   :  { %v277_v16 = vpop.f32.mrb[0].mxu0 }
 0x12b   :  { %v183_v18 = vadd.f32 %v277_v16, %v79_v14  ;;  %v174_v19 = vpop.f32.mrb[1].mxu0 }
 0x12c   :  { %v175_v21 = vadd.f32 %v174_v19, %v79_v14  ;;  %v278_v22 = vpop.f32.mrb[2].mxu0 }
 0x12d   :  { %vm191_vm0 = vcmp.ge.f32.partialorder %v183_v18, 0.0  ;;  %v195_v23 = vmul.f32 0.01, %v183_v18  ;;  %v186_v24 = vadd.f32 %v278_v22, %v79_v14  ;;  %v177_v25 = vpop.f32.mrb[3].mxu0 }
 0x12e   :  { %vm189_vm1 = vcmp.ge.f32.partialorder %v175_v21, 0.0  ;;  %v193_v27 = vmul.f32 0.01, %v175_v21  ;;  %v178_v28 = vadd.f32 %v177_v25, %v79_v14 }
 0x12f   :  { %v199_v29 = vsel %vm191_vm0, %v183_v18, %v195_v23  ;;  %vm192_vm2 = vcmp.ge.f32.partialorder %v186_v24, 0.0  ;;  %v196_v30 = vmul.f32 0.01, %v186_v24 }
 0x130   :  { %v207_v31 = vmul.f32 %v204_v20, %v199_v29  ;;  %v197_v32 = vsel %vm189_vm1, %v175_v21, %v193_v27  ;;  %vm190_vm3 = vcmp.ge.f32.partialorder %v178_v28, 0.0  ;;  %v194_v33 = vmul.f32 0.01, %v178_v28 }
 0x131   :  { %v205_v34 = vmul.f32 %v204_v20, %v197_v32  ;;  %v200_v35 = vsel %vm192_vm2, %v186_v24, %v196_v30 }
 0x132   :  { %v215_v36 = vadd.f32 %v212_v26, %v207_v31  ;;  %v208_v37 = vmul.f32 %v204_v20, %v200_v35  ;;  %v198_v38 = vsel %vm190_vm3, %v178_v28, %v194_v33 }
 0x133   :  { %v213_v39 = vadd.f32 %v212_v26, %v205_v34  ;;  %v206_v40 = vmul.f32 %v204_v20, %v198_v38 }
 0x134   :  { %219 = vst [vmem:[#allocation8 + $0x10] sm:$0xff] %v215_v36  ;;  %v216_v41 = vadd.f32 %v212_v26, %v208_v37 }
 0x135   :  { %217 = vst [vmem:[#allocation8] sm:$0xff] %v213_v39  ;;  %v214_v42 = vadd.f32 %v212_v26, %v206_v40 }
 0x136   :  { %220 = vst [vmem:[#allocation8 + $0x18] sm:$0xff] %v216_v41 }
 0x137   :  { %218 = vst [vmem:[#allocation8 + $0x8] sm:$0xff] %v214_v42 }
 0x138   :  { %374 = shalt.err (!%p371_p0)
}
 0x139   :  { %s375_s25 = scalar_lea.hbm %s477_s3, 512 }
 0x13a   :  { %p376_p1 = scmp.ne.s32.totalorder %s477_s3, %s375_s25  ;;  %p379_p2 = scmp.lt.u32.totalorder %s375_s25, %s477_s3 }
 0x13c   :  { %p381_p3 = pnand %p379_p2, %p376_p1 }
 0x13e   :  { %384 = shalt.err (!%p381_p3)
}
 0x13f   :  { %s397_s30 = smov 128   ;;  %s398_s4 = smov 8  }
 0x140   :  { %232 = dma.vmem_to_hbm [thread:$0]  %s227_s21, 512, %s477_s3, [#allocation4], %s397_s30, %s397_s30, %s398_s4  }
 0x141   :  { %389 = dma.done.wait [#allocation4], 512  }
 0x142   :  { %390 = vsyncadd [#allocation4], 4294966784 }
 0x143   :  { %236 = vsyncpa [#allocation3], 1 }
 0x144   :  { %237 = vsyncpa [#allocation6], 1 }
 0x145   :  { %238 = vsyncpa [#allocation4], 1 }

</bundles_post_ra>
